<compile_context>
chip_gen: v6e
topology: v6e:2x2x1
jax: 0.10.0
libtpu: 0.0.40
codegen_flags: <defaults>
</compile_context>

<pallas_src>
import functools
import math

import jax
import jax.numpy as jnp
from jax import lax
from jax.experimental import pallas as pl
from jax.experimental.pallas import tpu as pltpu

_LANE = 128


def _round_up(v, m):
    return ((v + m - 1) // m) * m


def _block_kernel(x_ref,
                  ln1g_ref, ln1b_ref,
                  wqkv_ref, bqkv_ref,
                  wo_ref, bo_ref,
                  ln2g_ref, ln2b_ref,
                  w1_ref, b1_ref, w2_ref, b2_ref,
                  o_ref,
                  *, n_head: int, e_real: int, seq: int):
    f32, bf16 = jnp.float32, jnp.bfloat16
    H, T, E = n_head, seq, e_real
    D = E // H
    EP = x_ref.shape[-1]                       # padded embedding dim (multiple of 128)
    inv_e = 1.0 / float(E)
    eps = 1e-5
    scale = 1.0 / math.sqrt(D)

    x = x_ref[...].reshape(T, EP)              # one batch element; padded lanes are exactly 0

    # Lane mask over real features (padded lanes excluded from the LayerNorm variance).
    lane_idx = lax.broadcasted_iota(jnp.int32, (1, EP), 1)
    lane_mask = (lane_idx < E).astype(f32)

    def layernorm(v, g, b):
        mu = jnp.sum(v, axis=-1, keepdims=True) * inv_e      # padded lanes are 0 -> sums OK
        c = (v - mu) * lane_mask                              # two-pass, padding masked out
        var = jnp.sum(c * c, axis=-1, keepdims=True) * inv_e
        # g, b are zero-padded -> padded lanes of the result stay exactly 0.
        return c * lax.rsqrt(var + eps) * g + b

    # ---- LayerNorm 1 + fused QKV projection (ONE wide MXU call) ----
    xn = layernorm(x, ln1g_ref[...], ln1b_ref[...])
    qkv = jnp.dot(xn.astype(bf16), wqkv_ref[...],
                  preferred_element_type=f32) + bqkv_ref[...]          # (T, QKVP)
    q = qkv[:, 0:E] * scale          # 1/sqrt(D) applied to the f32 accumulator (exact)
    k = qkv[:, E:2 * E]
    v = qkv[:, 2 * E:3 * E]

    # ---- Block-diagonal head mask: lanes [h*D, (h+1)*D) belong to head h ----
    e_idx = lax.broadcasted_iota(jnp.int32, (H, 1, E), 2)
    h_idx = lax.broadcasted_iota(jnp.int32, (H, 1, E), 0)
    head_mask = ((e_idx >= h_idx * D) & (e_idx < (h_idx + 1) * D)).astype(f32)   # (H,1,E)

    # Scores for ALL heads in one MXU call: masking q per head makes the E-contraction
    # restrict to that head's D lanes (k needs no masking — cross terms multiply by 0).
    qm = (q[None, :, :] * head_mask).reshape(H * T, E)
    s = jnp.einsum('ne,ke->nk', qm.astype(bf16), k.astype(bf16),
                   preferred_element_type=f32).reshape(H, T, T)

    # Causal additive bias (finite large-negative, no inf arithmetic).
    row = lax.broadcasted_iota(jnp.int32, (H, T, T), 1)
    col = lax.broadcasted_iota(jnp.int32, (H, T, T), 2)
    s = s + jnp.where(row >= col, 0.0, -1e30).astype(f32)

    m = jnp.max(s, axis=-1, keepdims=True)
    p = jnp.exp(s - m)
    denom = jnp.sum(p, axis=-1, keepdims=True)
    p = p * pl.reciprocal(denom, approx=True)          # EUP reciprocal, not a VPU divide
    # TODO(synk): attention-weight dropout omitted (eval mode / dropout = 0.0).

    # PV for ALL heads in one MXU call; then pick each head's own D lanes (tiny masked sum).
    pv = jnp.einsum('nk,ke->ne', p.reshape(H * T, T).astype(bf16), v.astype(bf16),
                    preferred_element_type=f32).reshape(H, T, E)
    ctx = jnp.sum(pv * head_mask, axis=0)              # (T, E) in per-head-packed lane layout

    # ---- Output projection: the head reduction happens inside this MXU contraction ----
    attn = jnp.dot(ctx.astype(bf16), wo_ref[...],
                   preferred_element_type=f32) + bo_ref[...]           # (T, EP)
    x1 = x + attn                                      # residual 1

    # ---- LayerNorm 2 + feed-forward (Linear -> ReLU -> Linear) ----
    xn2 = layernorm(x1, ln2g_ref[...], ln2b_ref[...])
    h1 = jnp.dot(xn2.astype(bf16), w1_ref[...], preferred_element_type=f32) + b1_ref[...]
    h1 = jnp.maximum(h1, 0.0)
    ff = jnp.dot(h1.astype(bf16), w2_ref[...], preferred_element_type=f32) + b2_ref[...]
    # TODO(synk): FFN output dropout omitted (eval mode / dropout = 0.0).

    o_ref[...] = (x1 + ff).reshape(1, T, EP)           # residual 2 (padded lanes remain 0)


def _prepare_inputs(x, params, n_head):
    """Pad to lane-dense (EP) shapes, fuse Wq|Wk|Wv into one (EP, round_up(3E,128)) bf16
    weight, keep the out-projection contraction at its real H*D size (no 16x D padding)."""
    B, T, E = x.shape
    assert E % n_head == 0
    H4 = 4 * E
    EP = _round_up(E, _LANE)
    QKVP = _round_up(3 * E, _LANE)
    H4P = _round_up(H4, _LANE)

    def pad(a, shape):
        return jnp.pad(a, [(0, s - d) for d, s in zip(a.shape, shape)])

    wqkv = jnp.concatenate([params["wq_t"], params["wk_t"], params["wv_t"]], axis=1)  # (E, 3E)
    bqkv = jnp.concatenate([params["bq"], params["bk"], params["bv"]], axis=1)        # (1, 3E)

    wqkv = pad(wqkv, (EP, QKVP)).astype(jnp.bfloat16)
    bqkv = pad(bqkv, (1, QKVP))
    wo = pad(params["wo_t"], (E, EP)).astype(jnp.bfloat16)    # contraction dim = H*D (real)
    bo = pad(params["bo"], (1, EP))
    w1 = pad(params["w1_t"], (EP, H4P)).astype(jnp.bfloat16)
    b1 = pad(params["b1"], (1, H4P))
    w2 = pad(params["w2_t"], (H4P, EP)).astype(jnp.bfloat16)
    b2 = pad(params["b2"], (1, EP))
    ln1g = pad(params["ln1_g"], (1, EP))
    ln1b = pad(params["ln1_b"], (1, EP))
    ln2g = pad(params["ln2_g"], (1, EP))
    ln2b = pad(params["ln2_b"], (1, EP))
    xp = pad(x, (B, T, EP))

    return (xp, ln1g, ln1b, wqkv, bqkv, wo, bo, ln2g, ln2b, w1, b1, w2, b2)


def causal_self_attention_block(x, params, n_head):
    """x: (B, T, E) float32. Returns the EP(=128)-lane padded output (B, T, EP); the padded
    lanes are exactly 0, so downstream ops can consume it directly or slice [..., :E]."""
    B, T, E = x.shape
    inputs = _prepare_inputs(x, params, n_head)
    EP = inputs[0].shape[-1]

    x_spec = pl.BlockSpec((1, T, EP), lambda b: (b, 0, 0))
    # Constant index_map -> weights stay VMEM-resident across grid steps (no re-DMA).
    weight_specs = [pl.BlockSpec(a.shape, lambda b: (0, 0)) for a in inputs[1:]]
    kernel = functools.partial(_block_kernel, n_head=n_head, e_real=E, seq=T)

    return pl.pallas_call(
        kernel,
        out_shape=jax.ShapeDtypeStruct((B, T, EP), jnp.float32),
        grid=(B,),                                   # batch-parallel; 2 TCs on v7x
        in_specs=[x_spec] + weight_specs,
        out_specs=pl.BlockSpec((1, T, EP), lambda b: (b, 0, 0)),
        compiler_params=pltpu.CompilerParams(dimension_semantics=("parallel",)),
    )(*inputs)


def init_params(key, n_embd):
    """Deterministic parameter init matching nn.MultiheadAttention / Linear shapes."""
    E, H4 = n_embd, 4 * n_embd
    ks = jax.random.split(key, 8)
    scale = 0.02
    # in_proj_weight is (3E, E) in torch; split & transpose to (E, E) each ("x @ W" layout).
    w_in = jax.random.normal(ks[0], (3 * E, E), jnp.float32) * scale
    b_in = jax.random.normal(ks[1], (3 * E,), jnp.float32) * scale
    w_out = jax.random.normal(ks[2], (E, E), jnp.float32) * scale     # out_proj.weight
    b_out = jax.random.normal(ks[3], (E,), jnp.float32) * scale
    w1 = jax.random.normal(ks[4], (H4, E), jnp.float32) * scale       # Linear(E,4E).weight
    b1 = jax.random.normal(ks[5], (H4,), jnp.float32) * scale
    w2 = jax.random.normal(ks[6], (E, H4), jnp.float32) * scale       # Linear(4E,E).weight
    b2 = jax.random.normal(ks[7], (E,), jnp.float32) * scale
    return {
        "ln1_g": jnp.ones((1, E), jnp.float32),
        "ln1_b": jnp.zeros((1, E), jnp.float32),
        "wq_t": w_in[0 * E:1 * E].T, "wk_t": w_in[1 * E:2 * E].T, "wv_t": w_in[2 * E:3 * E].T,
        "bq": b_in[0 * E:1 * E].reshape(1, E),
        "bk": b_in[1 * E:2 * E].reshape(1, E),
        "bv": b_in[2 * E:3 * E].reshape(1, E),
        "wo_t": w_out.T, "bo": b_out.reshape(1, E),
        "ln2_g": jnp.ones((1, E), jnp.float32),
        "ln2_b": jnp.zeros((1, E), jnp.float32),
        "w1_t": w1.T, "b1": b1.reshape(1, H4),
        "w2_t": w2.T, "b2": b2.reshape(1, E),
    }


def reference_block(x, p, n_head):
    """Pure-JAX f32 reference (mirrors PyTorch eval-mode forward)."""
    def ln(v, g, b):
        mu = jnp.mean(v, -1, keepdims=True)
        var = jnp.mean((v - mu) ** 2, -1, keepdims=True)
        return (v - mu) / jnp.sqrt(var + 1e-5) * g + b

    B, T, E = x.shape
    D = E // n_head
    res = x
    h = ln(x, p["ln1_g"], p["ln1_b"])
    q = h @ p["wq_t"] + p["bq"]
    k = h @ p["wk_t"] + p["bk"]
    v = h @ p["wv_t"] + p["bv"]
    q = q.reshape(B, T, n_head, D).transpose(0, 2, 1, 3)
    k = k.reshape(B, T, n_head, D).transpose(0, 2, 1, 3)
    v = v.reshape(B, T, n_head, D).transpose(0, 2, 1, 3)
    s = jnp.einsum("bhqd,bhkd->bhqk", q, k) / math.sqrt(D)
    mask = jnp.tril(jnp.ones((T, T), bool))
    s = jnp.where(mask, s, -jnp.inf)
    a = jax.nn.softmax(s, axis=-1)
    o = jnp.einsum("bhqk,bhkd->bhqd", a, v).transpose(0, 2, 1, 3).reshape(B, T, E)
    o = o @ p["wo_t"] + p["bo"]
    x1 = res + o
    h2 = ln(x1, p["ln2_g"], p["ln2_b"])
    ff = jnp.maximum(h2 @ p["w1_t"] + p["b1"], 0.0) @ p["w2_t"] + p["b2"]
    return x1 + ff


if __name__ == "__main__":
    B, T, E, H = 2, 8, 32, 4          # batch, block_size, n_embd, n_head; dropout = 0.0
    key = jax.random.PRNGKey(0)
    kx, kp = jax.random.split(key)
    x = jax.random.normal(kx, (B, T, E), jnp.float32)
    params = init_params(kp, E)

    out_padded = causal_self_attention_block(x, params, H)
    out_padded = jax.block_until_ready(out_padded)

    # Verification-only slice back to the logical width (padded lanes are exactly 0).
    out = out_padded[:, :, :E]
    ref = reference_block(x, params, H)
    assert out.shape == (B, T, E)
    max_err = float(jnp.max(jnp.abs(out - ref)))
    # Tolerance loosened vs pure-f32: matmuls use bf16 inputs (f32 accumulation).
    assert jnp.allclose(out, ref, atol=2e-2, rtol=2e-2), f"mismatch vs reference (max err {max_err})"
    print("KERNEL_OK")
</pallas_src>

<mosaic_0001>
module attributes {stable_mosaic.version = 11 : i64} {
  func.func @_block_kernel(%arg0: i32, %arg1: memref<1x8x128xf32, #tpu.memory_space<vmem>>, %arg2: memref<1x128xf32, #tpu.memory_space<vmem>>, %arg3: memref<1x128xf32, #tpu.memory_space<vmem>>, %arg4: memref<128x128xbf16, #tpu.memory_space<vmem>>, %arg5: memref<1x128xf32, #tpu.memory_space<vmem>>, %arg6: memref<32x128xbf16, #tpu.memory_space<vmem>>, %arg7: memref<1x128xf32, #tpu.memory_space<vmem>>, %arg8: memref<1x128xf32, #tpu.memory_space<vmem>>, %arg9: memref<1x128xf32, #tpu.memory_space<vmem>>, %arg10: memref<128x128xbf16, #tpu.memory_space<vmem>>, %arg11: memref<1x128xf32, #tpu.memory_space<vmem>>, %arg12: memref<128x128xbf16, #tpu.memory_space<vmem>>, %arg13: memref<1x128xf32, #tpu.memory_space<vmem>>, %arg14: memref<1x8x128xf32, #tpu.memory_space<vmem>>) attributes {dimension_semantics = [#tpu.dimension_semantics<parallel>], iteration_bounds = array<i64: 2>, scalar_prefetch = 0 : i64, scratch_operands = 0 : i64, tpu.core_type = #tpu.core_type<tc>, window_params = [{transform_indices = @transform_0, window_bounds = array<i64: 1, 8, 128>}, {pipeline_mode = #tpu.pipeline_mode<synchronous>, transform_indices = @transform_1, window_bounds = array<i64: 1, 128>}, {pipeline_mode = #tpu.pipeline_mode<synchronous>, transform_indices = @transform_2, window_bounds = array<i64: 1, 128>}, {pipeline_mode = #tpu.pipeline_mode<synchronous>, transform_indices = @transform_3, window_bounds = array<i64: 128, 128>}, {pipeline_mode = #tpu.pipeline_mode<synchronous>, transform_indices = @transform_4, window_bounds = array<i64: 1, 128>}, {pipeline_mode = #tpu.pipeline_mode<synchronous>, transform_indices = @transform_5, window_bounds = array<i64: 32, 128>}, {pipeline_mode = #tpu.pipeline_mode<synchronous>, transform_indices = @transform_6, window_bounds = array<i64: 1, 128>}, {pipeline_mode = #tpu.pipeline_mode<synchronous>, transform_indices = @transform_7, window_bounds = array<i64: 1, 128>}, {pipeline_mode = #tpu.pipeline_mode<synchronous>, transform_indices = @transform_8, window_bounds = array<i64: 1, 128>}, {pipeline_mode = #tpu.pipeline_mode<synchronous>, transform_indices = @transform_9, window_bounds = array<i64: 128, 128>}, {pipeline_mode = #tpu.pipeline_mode<synchronous>, transform_indices = @transform_10, window_bounds = array<i64: 1, 128>}, {pipeline_mode = #tpu.pipeline_mode<synchronous>, transform_indices = @transform_11, window_bounds = array<i64: 128, 128>}, {pipeline_mode = #tpu.pipeline_mode<synchronous>, transform_indices = @transform_12, window_bounds = array<i64: 1, 128>}, {transform_indices = @transform_13, window_bounds = array<i64: 1, 8, 128>}]} {
    %c0 = arith.constant 0 : index
    %c0_0 = arith.constant 0 : index
    %c0_1 = arith.constant 0 : index
    %0 = vector.load %arg1[%c0, %c0_0, %c0_1] : memref<1x8x128xf32, #tpu.memory_space<vmem>>, vector<1x8x128xf32>
    %1 = vector.shape_cast %0 : vector<1x8x128xf32> to vector<8x128xf32>
    %2 = tpu.iota {dimensions = array<i32: 1>} : vector<1x128xi32>
    %c32_i32 = arith.constant 32 : i32
    %3 = vector.broadcast %c32_i32 : i32 to vector<1x128xi32>
    %4 = arith.cmpi slt, %2, %3 : vector<1x128xi32>
    %5 = arith.extui %4 : vector<1x128xi1> to vector<1x128xi32>
    %6 = arith.sitofp %5 : vector<1x128xi32> to vector<1x128xf32>
    %c0_2 = arith.constant 0 : index
    %c0_3 = arith.constant 0 : index
    %7 = vector.load %arg2[%c0_2, %c0_3] : memref<1x128xf32, #tpu.memory_space<vmem>>, vector<1x128xf32>
    %c0_4 = arith.constant 0 : index
    %c0_5 = arith.constant 0 : index
    %8 = vector.load %arg3[%c0_4, %c0_5] : memref<1x128xf32, #tpu.memory_space<vmem>>, vector<1x128xf32>
    %cst = arith.constant dense<0.000000e+00> : vector<8xf32>
    %9 = vector.multi_reduction <add>, %1, %cst [1] : vector<8x128xf32> to vector<8xf32>
    %10 = vector.shape_cast %9 : vector<8xf32> to vector<8x1xf32>
    %cst_6 = arith.constant 3.125000e-02 : f32
    %11 = vector.broadcast %cst_6 : f32 to vector<8x1xf32>
    %12 = arith.mulf %10, %11 : vector<8x1xf32>
    %13 = vector.broadcast %12 : vector<8x1xf32> to vector<8x128xf32>
    %14 = arith.subf %1, %13 : vector<8x128xf32>
    %15 = vector.broadcast %6 : vector<1x128xf32> to vector<8x128xf32>
    %16 = arith.mulf %14, %15 : vector<8x128xf32>
    %17 = arith.mulf %16, %16 : vector<8x128xf32>
    %cst_7 = arith.constant dense<0.000000e+00> : vector<8xf32>
    %18 = vector.multi_reduction <add>, %17, %cst_7 [1] : vector<8x128xf32> to vector<8xf32>
    %19 = vector.shape_cast %18 : vector<8xf32> to vector<8x1xf32>
    %cst_8 = arith.constant 3.125000e-02 : f32
    %20 = vector.broadcast %cst_8 : f32 to vector<8x1xf32>
    %21 = arith.mulf %19, %20 : vector<8x1xf32>
    %cst_9 = arith.constant 9.99999974E-6 : f32
    %22 = vector.broadcast %cst_9 : f32 to vector<8x1xf32>
    %23 = arith.addf %21, %22 : vector<8x1xf32>
    %24 = math.rsqrt %23 : vector<8x1xf32>
    %25 = vector.broadcast %24 : vector<8x1xf32> to vector<8x128xf32>
    %26 = arith.mulf %16, %25 : vector<8x128xf32>
    %27 = vector.broadcast %7 : vector<1x128xf32> to vector<8x128xf32>
    %28 = arith.mulf %26, %27 : vector<8x128xf32>
    %29 = vector.broadcast %8 : vector<1x128xf32> to vector<8x128xf32>
    %30 = arith.addf %28, %29 : vector<8x128xf32>
    %31 = arith.truncf %30 : vector<8x128xf32> to vector<8x128xbf16>
    %c0_10 = arith.constant 0 : index
    %c0_11 = arith.constant 0 : index
    %32 = vector.load %arg4[%c0_10, %c0_11] : memref<128x128xbf16, #tpu.memory_space<vmem>>, vector<128x128xbf16>
    %cst_12 = arith.constant dense<0.000000e+00> : vector<8x128xf32>
    %33 = tpu.matmul %31, %32, %cst_12 {dimension_numbers = #tpu.dot_dimension_numbers<[1], [0], [0], [1], [0, 0, 1, 1], [], []>} : vector<8x128xbf16>, vector<128x128xbf16>, vector<8x128xf32> -> vector<8x128xf32>
    %c0_13 = arith.constant 0 : index
    %c0_14 = arith.constant 0 : index
    %34 = vector.load %arg5[%c0_13, %c0_14] : memref<1x128xf32, #tpu.memory_space<vmem>>, vector<1x128xf32>
    %35 = vector.broadcast %34 : vector<1x128xf32> to vector<8x128xf32>
    %36 = arith.addf %33, %35 : vector<8x128xf32>
    %37 = vector.extract_strided_slice %36 {offsets = [0, 0], sizes = [8, 32], strides = [1, 1]} : vector<8x128xf32> to vector<8x32xf32>
    %cst_15 = arith.constant 0.353553385 : f32
    %38 = vector.broadcast %cst_15 : f32 to vector<8x32xf32>
    %39 = arith.mulf %37, %38 : vector<8x32xf32>
    %40 = vector.extract_strided_slice %36 {offsets = [0, 32], sizes = [8, 32], strides = [1, 1]} : vector<8x128xf32> to vector<8x32xf32>
    %41 = vector.extract_strided_slice %36 {offsets = [0, 64], sizes = [8, 32], strides = [1, 1]} : vector<8x128xf32> to vector<8x32xf32>
    %42 = tpu.iota {dimensions = array<i32: 2>} : vector<4x1x32xi32>
    %43 = tpu.iota {dimensions = array<i32: 0>} : vector<4x1x32xi32>
    %c8_i32 = arith.constant 8 : i32
    %44 = vector.broadcast %c8_i32 : i32 to vector<4x1x32xi32>
    %45 = arith.muli %43, %44 : vector<4x1x32xi32>
    %46 = arith.cmpi sge, %42, %45 : vector<4x1x32xi32>
    %c1_i32 = arith.constant 1 : i32
    %47 = vector.broadcast %c1_i32 : i32 to vector<4x1x32xi32>
    %48 = arith.addi %43, %47 : vector<4x1x32xi32>
    %c8_i32_16 = arith.constant 8 : i32
    %49 = vector.broadcast %c8_i32_16 : i32 to vector<4x1x32xi32>
    %50 = arith.muli %48, %49 : vector<4x1x32xi32>
    %51 = arith.cmpi slt, %42, %50 : vector<4x1x32xi32>
    %52 = arith.andi %46, %51 : vector<4x1x32xi1>
    %53 = arith.extui %52 : vector<4x1x32xi1> to vector<4x1x32xi32>
    %54 = arith.sitofp %53 : vector<4x1x32xi32> to vector<4x1x32xf32>
    %55 = vector.shape_cast %39 : vector<8x32xf32> to vector<1x8x32xf32>
    %56 = vector.broadcast %55 : vector<1x8x32xf32> to vector<4x8x32xf32>
    %57 = vector.broadcast %54 : vector<4x1x32xf32> to vector<4x8x32xf32>
    %58 = arith.mulf %56, %57 : vector<4x8x32xf32>
    %59 = vector.shape_cast %58 : vector<4x8x32xf32> to vector<32x32xf32>
    %60 = arith.truncf %59 : vector<32x32xf32> to vector<32x32xbf16>
    %61 = arith.truncf %40 : vector<8x32xf32> to vector<8x32xbf16>
    "tpu.trace_start"() <{level = 10 : i32, message = "ne,ke->nk"}> : () -> ()
    %cst_17 = arith.constant dense<0.000000e+00> : vector<32x8xf32>
    %62 = tpu.matmul %60, %61, %cst_17 {dimension_numbers = #tpu.dot_dimension_numbers<[1], [1], [0], [0], [0, 0, 1, 0], [], []>} : vector<32x32xbf16>, vector<8x32xbf16>, vector<32x8xf32> -> vector<32x8xf32>
    "tpu.trace_stop"() : () -> ()
    %63 = vector.shape_cast %62 : vector<32x8xf32> to vector<4x8x8xf32>
    %64 = tpu.iota {dimensions = array<i32: 1>} : vector<4x8x8xi32>
    %65 = tpu.iota {dimensions = array<i32: 2>} : vector<4x8x8xi32>
    %66 = arith.cmpi sge, %64, %65 : vector<4x8x8xi32>
    %cst_18 = arith.constant 0.000000e+00 : f32
    %cst_19 = arith.constant -1.000000e+30 : f32
    %67 = vector.broadcast %cst_18 : f32 to vector<4x8x8xf32>
    %68 = vector.broadcast %cst_19 : f32 to vector<4x8x8xf32>
    %69 = arith.select %66, %67, %68 : vector<4x8x8xi1>, vector<4x8x8xf32>
    %70 = arith.addf %63, %69 : vector<4x8x8xf32>
    %cst_20 = arith.constant dense<0xFF800000> : vector<4x8xf32>
    %71 = vector.multi_reduction <maximumf>, %70, %cst_20 [2] : vector<4x8x8xf32> to vector<4x8xf32>
    %72 = vector.shape_cast %71 : vector<4x8xf32> to vector<4x8x1xf32>
    %73 = vector.broadcast %72 : vector<4x8x1xf32> to vector<4x8x8xf32>
    %74 = arith.subf %70, %73 : vector<4x8x8xf32>
    %75 = math.exp %74 : vector<4x8x8xf32>
    %cst_21 = arith.constant dense<0.000000e+00> : vector<4x8xf32>
    %76 = vector.multi_reduction <add>, %75, %cst_21 [2] : vector<4x8x8xf32> to vector<4x8xf32>
    %77 = vector.shape_cast %76 : vector<4x8xf32> to vector<4x8x1xf32>
    %78 = tpu.reciprocal %77 {approx = true} : vector<4x8x1xf32> -> vector<4x8x1xf32>
    %79 = vector.broadcast %78 : vector<4x8x1xf32> to vector<4x8x8xf32>
    %80 = arith.mulf %75, %79 : vector<4x8x8xf32>
    %81 = vector.shape_cast %80 : vector<4x8x8xf32> to vector<32x8xf32>
    %82 = arith.truncf %81 : vector<32x8xf32> to vector<32x8xbf16>
    %83 = arith.truncf %41 : vector<8x32xf32> to vector<8x32xbf16>
    "tpu.trace_start"() <{level = 10 : i32, message = "nk,ke->ne"}> : () -> ()
    %cst_22 = arith.constant dense<0.000000e+00> : vector<32x32xf32>
    %84 = tpu.matmul %82, %83, %cst_22 {dimension_numbers = #tpu.dot_dimension_numbers<[1], [0], [0], [1], [0, 0, 1, 1], [], []>} : vector<32x8xbf16>, vector<8x32xbf16>, vector<32x32xf32> -> vector<32x32xf32>
    "tpu.trace_stop"() : () -> ()
    %85 = vector.shape_cast %84 : vector<32x32xf32> to vector<4x8x32xf32>
    %86 = vector.broadcast %54 : vector<4x1x32xf32> to vector<4x8x32xf32>
    %87 = arith.mulf %85, %86 : vector<4x8x32xf32>
    %cst_23 = arith.constant dense<0.000000e+00> : vector<8x32xf32>
    %88 = vector.multi_reduction <add>, %87, %cst_23 [0] : vector<4x8x32xf32> to vector<8x32xf32>
    %89 = arith.truncf %88 : vector<8x32xf32> to vector<8x32xbf16>
    %c0_24 = arith.constant 0 : index
    %c0_25 = arith.constant 0 : index
    %90 = vector.load %arg6[%c0_24, %c0_25] : memref<32x128xbf16, #tpu.memory_space<vmem>>, vector<32x128xbf16>
    %cst_26 = arith.constant dense<0.000000e+00> : vector<8x128xf32>
    %91 = tpu.matmul %89, %90, %cst_26 {dimension_numbers = #tpu.dot_dimension_numbers<[1], [0], [0], [1], [0, 0, 1, 1], [], []>} : vector<8x32xbf16>, vector<32x128xbf16>, vector<8x128xf32> -> vector<8x128xf32>
    %c0_27 = arith.constant 0 : index
    %c0_28 = arith.constant 0 : index
    %92 = vector.load %arg7[%c0_27, %c0_28] : memref<1x128xf32, #tpu.memory_space<vmem>>, vector<1x128xf32>
    %93 = vector.broadcast %92 : vector<1x128xf32> to vector<8x128xf32>
    %94 = arith.addf %91, %93 : vector<8x128xf32>
    %95 = arith.addf %1, %94 : vector<8x128xf32>
    %c0_29 = arith.constant 0 : index
    %c0_30 = arith.constant 0 : index
    %96 = vector.load %arg8[%c0_29, %c0_30] : memref<1x128xf32, #tpu.memory_space<vmem>>, vector<1x128xf32>
    %c0_31 = arith.constant 0 : index
    %c0_32 = arith.constant 0 : index
    %97 = vector.load %arg9[%c0_31, %c0_32] : memref<1x128xf32, #tpu.memory_space<vmem>>, vector<1x128xf32>
    %cst_33 = arith.constant dense<0.000000e+00> : vector<8xf32>
    %98 = vector.multi_reduction <add>, %95, %cst_33 [1] : vector<8x128xf32> to vector<8xf32>
    %99 = vector.shape_cast %98 : vector<8xf32> to vector<8x1xf32>
    %cst_34 = arith.constant 3.125000e-02 : f32
    %100 = vector.broadcast %cst_34 : f32 to vector<8x1xf32>
    %101 = arith.mulf %99, %100 : vector<8x1xf32>
    %102 = vector.broadcast %101 : vector<8x1xf32> to vector<8x128xf32>
    %103 = arith.subf %95, %102 : vector<8x128xf32>
    %104 = vector.broadcast %6 : vector<1x128xf32> to vector<8x128xf32>
    %105 = arith.mulf %103, %104 : vector<8x128xf32>
    %106 = arith.mulf %105, %105 : vector<8x128xf32>
    %cst_35 = arith.constant dense<0.000000e+00> : vector<8xf32>
    %107 = vector.multi_reduction <add>, %106, %cst_35 [1] : vector<8x128xf32> to vector<8xf32>
    %108 = vector.shape_cast %107 : vector<8xf32> to vector<8x1xf32>
    %cst_36 = arith.constant 3.125000e-02 : f32
    %109 = vector.broadcast %cst_36 : f32 to vector<8x1xf32>
    %110 = arith.mulf %108, %109 : vector<8x1xf32>
    %cst_37 = arith.constant 9.99999974E-6 : f32
    %111 = vector.broadcast %cst_37 : f32 to vector<8x1xf32>
    %112 = arith.addf %110, %111 : vector<8x1xf32>
    %113 = math.rsqrt %112 : vector<8x1xf32>
    %114 = vector.broadcast %113 : vector<8x1xf32> to vector<8x128xf32>
    %115 = arith.mulf %105, %114 : vector<8x128xf32>
    %116 = vector.broadcast %96 : vector<1x128xf32> to vector<8x128xf32>
    %117 = arith.mulf %115, %116 : vector<8x128xf32>
    %118 = vector.broadcast %97 : vector<1x128xf32> to vector<8x128xf32>
    %119 = arith.addf %117, %118 : vector<8x128xf32>
    %120 = arith.truncf %119 : vector<8x128xf32> to vector<8x128xbf16>
    %c0_38 = arith.constant 0 : index
    %c0_39 = arith.constant 0 : index
    %121 = vector.load %arg10[%c0_38, %c0_39] : memref<128x128xbf16, #tpu.memory_space<vmem>>, vector<128x128xbf16>
    %cst_40 = arith.constant dense<0.000000e+00> : vector<8x128xf32>
    %122 = tpu.matmul %120, %121, %cst_40 {dimension_numbers = #tpu.dot_dimension_numbers<[1], [0], [0], [1], [0, 0, 1, 1], [], []>} : vector<8x128xbf16>, vector<128x128xbf16>, vector<8x128xf32> -> vector<8x128xf32>
    %c0_41 = arith.constant 0 : index
    %c0_42 = arith.constant 0 : index
    %123 = vector.load %arg11[%c0_41, %c0_42] : memref<1x128xf32, #tpu.memory_space<vmem>>, vector<1x128xf32>
    %124 = vector.broadcast %123 : vector<1x128xf32> to vector<8x128xf32>
    %125 = arith.addf %122, %124 : vector<8x128xf32>
    %cst_43 = arith.constant 0.000000e+00 : f32
    %126 = vector.broadcast %cst_43 : f32 to vector<8x128xf32>
    %127 = arith.maximumf %125, %126 : vector<8x128xf32>
    %128 = arith.truncf %127 : vector<8x128xf32> to vector<8x128xbf16>
    %c0_44 = arith.constant 0 : index
    %c0_45 = arith.constant 0 : index
    %129 = vector.load %arg12[%c0_44, %c0_45] : memref<128x128xbf16, #tpu.memory_space<vmem>>, vector<128x128xbf16>
    %cst_46 = arith.constant dense<0.000000e+00> : vector<8x128xf32>
    %130 = tpu.matmul %128, %129, %cst_46 {dimension_numbers = #tpu.dot_dimension_numbers<[1], [0], [0], [1], [0, 0, 1, 1], [], []>} : vector<8x128xbf16>, vector<128x128xbf16>, vector<8x128xf32> -> vector<8x128xf32>
    %c0_47 = arith.constant 0 : index
    %c0_48 = arith.constant 0 : index
    %131 = vector.load %arg13[%c0_47, %c0_48] : memref<1x128xf32, #tpu.memory_space<vmem>>, vector<1x128xf32>
    %132 = vector.broadcast %131 : vector<1x128xf32> to vector<8x128xf32>
    %133 = arith.addf %130, %132 : vector<8x128xf32>
    %134 = arith.addf %95, %133 : vector<8x128xf32>
    %135 = vector.shape_cast %134 : vector<8x128xf32> to vector<1x8x128xf32>
    %c0_49 = arith.constant 0 : index
    %c0_50 = arith.constant 0 : index
    %c0_51 = arith.constant 0 : index
    %136 = vector.load %arg14[%c0_49, %c0_50, %c0_51] : memref<1x8x128xf32, #tpu.memory_space<vmem>>, vector<1x8x128xf32>
    tpu.vector_store %arg14[%c0_49, %c0_50, %c0_51], %135 {strides = array<i32>} : memref<1x8x128xf32, #tpu.memory_space<vmem>>, vector<1x8x128xf32>,
    return
  }
  func.func @transform_0(%arg0: i32) -> (i32, i32, i32) {
    %c0_i32 = arith.constant 0 : i32
    %c0_i32_0 = arith.constant 0 : i32
    %c0_i32_1 = arith.constant 0 : i32
    return %arg0, %c0_i32, %c0_i32_0 : i32, i32, i32
  }
  func.func @transform_1(%arg0: i32) -> (i32, i32) {
    %c0_i32 = arith.constant 0 : i32
    %c0_i32_0 = arith.constant 0 : i32
    %c0_i32_1 = arith.constant 0 : i32
    return %c0_i32, %c0_i32_0 : i32, i32
  }
  func.func @transform_2(%arg0: i32) -> (i32, i32) {
    %c0_i32 = arith.constant 0 : i32
    %c0_i32_0 = arith.constant 0 : i32
    %c0_i32_1 = arith.constant 0 : i32
    return %c0_i32, %c0_i32_0 : i32, i32
  }
  func.func @transform_3(%arg0: i32) -> (i32, i32) {
    %c0_i32 = arith.constant 0 : i32
    %c0_i32_0 = arith.constant 0 : i32
    %c0_i32_1 = arith.constant 0 : i32
    return %c0_i32, %c0_i32_0 : i32, i32
  }
  func.func @transform_4(%arg0: i32) -> (i32, i32) {
    %c0_i32 = arith.constant 0 : i32
    %c0_i32_0 = arith.constant 0 : i32
    %c0_i32_1 = arith.constant 0 : i32
    return %c0_i32, %c0_i32_0 : i32, i32
  }
  func.func @transform_5(%arg0: i32) -> (i32, i32) {
    %c0_i32 = arith.constant 0 : i32
    %c0_i32_0 = arith.constant 0 : i32
    %c0_i32_1 = arith.constant 0 : i32
    return %c0_i32, %c0_i32_0 : i32, i32
  }
  func.func @transform_6(%arg0: i32) -> (i32, i32) {
    %c0_i32 = arith.constant 0 : i32
    %c0_i32_0 = arith.constant 0 : i32
    %c0_i32_1 = arith.constant 0 : i32
    return %c0_i32, %c0_i32_0 : i32, i32
  }
  func.func @transform_7(%arg0: i32) -> (i32, i32) {
    %c0_i32 = arith.constant 0 : i32
    %c0_i32_0 = arith.constant 0 : i32
    %c0_i32_1 = arith.constant 0 : i32
    return %c0_i32, %c0_i32_0 : i32, i32
  }
  func.func @transform_8(%arg0: i32) -> (i32, i32) {
    %c0_i32 = arith.constant 0 : i32
    %c0_i32_0 = arith.constant 0 : i32
    %c0_i32_1 = arith.constant 0 : i32
    return %c0_i32, %c0_i32_0 : i32, i32
  }
  func.func @transform_9(%arg0: i32) -> (i32, i32) {
    %c0_i32 = arith.constant 0 : i32
    %c0_i32_0 = arith.constant 0 : i32
    %c0_i32_1 = arith.constant 0 : i32
    return %c0_i32, %c0_i32_0 : i32, i32
  }
  func.func @transform_10(%arg0: i32) -> (i32, i32) {
    %c0_i32 = arith.constant 0 : i32
    %c0_i32_0 = arith.constant 0 : i32
    %c0_i32_1 = arith.constant 0 : i32
    return %c0_i32, %c0_i32_0 : i32, i32
  }
  func.func @transform_11(%arg0: i32) -> (i32, i32) {
    %c0_i32 = arith.constant 0 : i32
    %c0_i32_0 = arith.constant 0 : i32
    %c0_i32_1 = arith.constant 0 : i32
    return %c0_i32, %c0_i32_0 : i32, i32
  }
  func.func @transform_12(%arg0: i32) -> (i32, i32) {
    %c0_i32 = arith.constant 0 : i32
    %c0_i32_0 = arith.constant 0 : i32
    %c0_i32_1 = arith.constant 0 : i32
    return %c0_i32, %c0_i32_0 : i32, i32
  }
  func.func @transform_13(%arg0: i32) -> (i32, i32, i32) {
    %c0_i32 = arith.constant 0 : i32
    %c0_i32_0 = arith.constant 0 : i32
    %c0_i32_1 = arith.constant 0 : i32
    return %arg0, %c0_i32, %c0_i32_0 : i32, i32, i32
  }
}

</mosaic_0001>

<bundles_post_ra>
// kernel: tpu_custom_call.1
= control target key start
LH: loop header
LB: loop body
LE: loop exit
PB: predicated region body
PF: predicated region fallthrough
CT: control target
= control target key end

     0   :  { %s2296_s0 = inlined_call_operand.hbm [shape: f32[2,8,128], index: 0, kind: input, shape index: {}]   ;;  %s2297_s1 = inlined_call_operand.vmem [shape: f32[1,128], index: 1, kind: input, shape index: {}]   ;;  %s2298_s2 = inlined_call_operand.vmem [shape: f32[1,128], index: 2, kind: input, shape index: {}]   ;;  %s2299_s3 = inlined_call_operand.hbm [shape: bf16[128,128], index: 3, kind: input, shape index: {}]   ;;  %s2300_s4 = inlined_call_operand.vmem [shape: f32[1,128], index: 4, kind: input, shape index: {}]   ;;  %s2301_s5 = inlined_call_operand.hbm [shape: bf16[32,128], index: 5, kind: input, shape index: {}]   ;;  %s2302_s6 = inlined_call_operand.vmem [shape: f32[1,128], index: 6, kind: input, shape index: {}]   ;;  %s2303_s7 = inlined_call_operand.vmem [shape: f32[1,128], index: 7, kind: input, shape index: {}]   ;;  %s2304_s8 = inlined_call_operand.vmem [shape: f32[1,128], index: 8, kind: input, shape index: {}]   ;;  %s2305_s9 = inlined_call_operand.hbm [shape: bf16[128,128], index: 9, kind: input, shape index: {}]   ;;  %s2306_s10 = inlined_call_operand.vmem [shape: f32[1,128], index: 10, kind: input, shape index: {}]   ;;  %s2307_s11 = inlined_call_operand.hbm [shape: bf16[128,128], index: 11, kind: input, shape index: {}]   ;;  %s2308_s12 = inlined_call_operand.vmem [shape: f32[1,128], index: 12, kind: input, shape index: {}]   ;;  %s2309_s13 = inlined_call_operand.hbm [shape: f32[2,8,128], index: 13, kind: output, shape index: {}]  }
   0x1   :  { %2318 = sst [smem:[#allocation20_spill]] %s2299_s3 }
   0x2   :  { %2319 = sst [smem:[#allocation21_spill]] %s2301_s5 }
   0x3   :  { %2320 = sst [smem:[#allocation22_spill]] %s2305_s9 }
   0x4   :  { %2321 = sst [smem:[#allocation23_spill]] %s2307_s11 }
   0x5   :  { %18 = vsyncpa [#allocation3], 0 }
   0x6   :  { %20 = vsyncpa [#allocation3 + $0x1], 0 }
   0x7   :  { %21 = vsyncpa [#allocation6], 0 }
   0x8   :  { %22 = vsyncpa [#allocation9], 0 }
   0x9   :  { %23 = vsyncpa [#allocation4], 0 }
   0xa   :  { %25 = vsyncpa [#allocation4 + $0x1], 0  ;;  %s1933_s25 = smov 0   ;;  %s1935_s26 = smov 0  }
   0xb   :  { %s1937_s27 = smov 0   ;;  %s1939_s28 = smov 0  }
   0xc LB: > { %2322 = sst [smem:[#allocation16_spill]] %s1844_s27  ;;  %s1850_s29 = smov [#allocation5]   ;;  %s1848_s28 = sphi %s1939_s28, %s2347_s28   ;;  %s1844_s27 = sphi %s1937_s27, %s2349_s27   ;;  %s1840_s26 = sphi %s1935_s26, %s2351_s26   ;;  %s1836_s25 = sphi %s1933_s25, %s2350_s25  }
   0xd   : > { %2323 = sst [smem:[#allocation17_spill]] %s1848_s28  ;;  %s358_s30 = sshll.u32 %s1850_s29, 4  ;;  %s359_s30 = int_to_ptr.vmem [resolvable:$true] %s358_s30 }
   0xe   : > { %s1954_s14 = sadd.s32 4294967295, %s1848_s28   ;;  %p1323_p0 = scmp.ge.s32.totalorder %s1848_s28, 1 }
   0xf   : > { %p2311_p1 = scmp.eq.s32.totalorder %s1954_s14, 0  ;;  %p340_p2 = scmp.lt.s32.totalorder %s1848_s28, 3 }
  0x10   : > { %s1851_s16 = smov [#allocation8]   ;;  %s1852_s19 = smov [#allocation7]  }
  0x11   : > { %p1959_p3 = pnand %p1323_p0, %p340_p2  ;;  %s396_s17 = sshll.u32 %s1851_s16, 4  ;;  %s1972_s17 = int_to_ptr.vmem [resolvable:$true] %s396_s17 }
  0x12   : > { %s374_s20 = sshll.u32 %s1852_s19, 4  ;;  %s1655_s21 = scalar_lea.vmem %s359_s30, 1024  ;;  %s1974_s20 = int_to_ptr.vmem [resolvable:$true] %s374_s20 }
  0x13   : > { %s2324_s15 = scalar_select %p1959_p3, 1, 0 }
  0x14   : > { %p1524_p5 = pneg %p1959_p3  ;;  %p1656_p8 = scmp.ne.s32.totalorder %s359_s30, %s1655_s21 }
  0x15   : > { %p1663_p11 = scmp.lt.s32.totalorder %s359_s30, %s359_s30  ;;  %p1664_p12 = scmp.lt.s32.totalorder %s1655_s21, %s1655_s21 }
  0x16   : > { %p1968_p6 = pnand %p1524_p5, %p2311_p1 }
  0x17   : > { %p1665_p13 = por %p1664_p12, %p1663_p11 }
  0x18   : > { %p1646_p7 = pneg %p1968_p6 }
  0x1a   : > { %p1658_p9 = pnand %p1656_p8, %p1646_p7 }
  0x1c   : > { %p1659_p10 = pneg %p1658_p9 }
  0x1e   : > { %p1666_p0 = pnand %p1665_p13, %p1659_p10 }
  0x20   : > { %1669 = shalt.err (!%p1666_p0)
}
  0x21   : > { %s1853_s22 = smov 64   ;;  %s1854_s23 = smov 4  }
  0x22   : > { %s2326_s3 = sld [smem:[#allocation20_spill]]  ;;  %s1681_s16 = scalar_lea.vmem %s1972_s17, 1024 }
  0x23   : > { %p1682_p2 = scmp.ne.s32.totalorder %s1972_s17, %s1681_s16  ;;  %p1689_p9 = scmp.lt.s32.totalorder %s1972_s17, %s1972_s17 }
  0x24   : > { %p1690_p10 = scmp.lt.s32.totalorder %s1681_s16, %s1681_s16 }
  0x25   : > { %p1684_p5 = pnand %p1682_p2, %p1646_p7 }
  0x26   : > { %p1691_p11 = por %p1690_p10, %p1689_p9 }
  0x27   : > { %p1685_p8 = pneg %p1684_p5 }
  0x28   : > { %1527 = dma.hbm_to_vmem [thread:$0]  (!%p1968_p6), %s2326_s3, 1024, %s359_s30, [#allocation6], %s1853_s22, %s1853_s22, %s1854_s23  }
  0x29   : > { %p1692_p12 = pnand %p1691_p11, %p1685_p8 }
  0x2b   : > { %1695 = shalt.err (!%p1692_p12)
}
  0x2c   : > { %s2327_s9 = sld [smem:[#allocation22_spill]]  ;;  %s1707_s21 = scalar_lea.vmem %s1974_s20, 256 }
  0x2d   : > { %p1708_p13 = scmp.ne.s32.totalorder %s1974_s20, %s1707_s21  ;;  %p1715_p5 = scmp.lt.s32.totalorder %s1974_s20, %s1974_s20 }
  0x2e   : > { %p1716_p8 = scmp.lt.s32.totalorder %s1707_s21, %s1707_s21 }
  0x2f   : > { %p1710_p0 = pnand %p1708_p13, %p1646_p7 }
  0x30   : > { %p1717_p9 = por %p1716_p8, %p1715_p5 }
  0x31   : > { %p1711_p2 = pneg %p1710_p0 }
  0x32   : > { %1533 = dma.hbm_to_vmem [thread:$0]  (!%p1968_p6), %s2327_s9, 1024, %s1972_s17, [#allocation9], %s1853_s22, %s1853_s22, %s1854_s23  }
  0x33   : > { %p1718_p10 = pnand %p1717_p9, %p1711_p2 }
  0x35   : > { %1721 = shalt.err (!%p1718_p10)
}
  0x36   : > { %s2328_s5 = sld [smem:[#allocation21_spill]]  ;;  %s1855_s29 = smov [#allocation10]  }
  0x37   : > { %s412_s16 = sshll.u32 %s1855_s29, 4  ;;  %s413_s16 = int_to_ptr.vmem [resolvable:$true] %s412_s16 }
  0x38   : > { %s1733_s19 = scalar_lea.vmem %s413_s16, 1024  ;;  %p1741_p0 = scmp.lt.s32.totalorder %s413_s16, %s413_s16 }
  0x39   : > { %p1734_p11 = scmp.ne.s32.totalorder %s413_s16, %s1733_s19  ;;  %p1742_p2 = scmp.lt.s32.totalorder %s1733_s19, %s1733_s19 }
  0x3b   : > { %p1736_p12 = pnand %p1734_p11, %p1646_p7  ;;  %p1743_p5 = por %p1742_p2, %p1741_p0 }
  0x3c   : > { %1530 = dma.hbm_to_vmem [thread:$0]  (!%p1968_p6), %s2328_s5, 256, %s1974_s20, [#allocation6], %s1853_s22, %s1853_s22, %s1854_s23  }
  0x3d   : > { %p1737_p13 = pneg %p1736_p12 }
  0x3f   : > { %p1744_p8 = pnand %p1743_p5, %p1737_p13 }
  0x41   : > { %1747 = shalt.err (!%p1744_p8)
}
  0x42   : > { %s2329_s11 = sld [smem:[#allocation23_spill]]  ;;  %s1322_s18 = sadd.s32 4294967294, %s1848_s28  }
  0x43   : > { %s2034_s21 = sadd.s32 1, %s1848_s28   ;;  %s38_s17 = sadd.s32 1, %s1844_s27 }
  0x44   : > { %2330 = sst [smem:[#allocation18_spill]] %s2034_s21  ;;  %s35_s24 = ssub.s32 %s1848_s28, %s2034_s21 }
  0x45   : > { %p36_p7 = scmp.eq.s32.totalorder %s35_s24, 0  ;;  %p45_p9 = scmp.ne.s32.totalorder %s1844_s27, %s1840_s26 }
  0x46   : > { %p46_p10 = scmp.eq.s32.totalorder %s1848_s28, 0  ;;  %p51_p11 = scmp.ne.s32.totalorder %s1840_s26, %s1836_s25 }
  0x47   : > { %s2045_s29 = scalar_select %p36_p7, %s1844_s27, %s38_s17  }
  0x48   : > { %1536 = dma.hbm_to_vmem [thread:$0]  (!%p1968_p6), %s2329_s11, 1024, %s413_s16, [#allocation9], %s1853_s22, %s1853_s22, %s1854_s23  }
  0x49   : > { %2331 = sst [smem:[#allocation19_spill]] %s2045_s29  ;;  %p2047_p12 = por %p46_p10, %p45_p9 }
  0x4a   : > { %p2053_p6 = por %p2311_p1, %p51_p11  ;;  %p327_p13 = scmp.eq.s32.totalorder %s1954_s14, 1 }
  0x4b   : > { %p333_p0 = scmp.eq.s32.totalorder %s1322_s18, 1  ;;  %p1549_p2 = scmp.lt.s32.totalorder %s1848_s28, 2 }
  0x4c   : > { %s2333_s22 = scalar_select %p2053_p6, 1, 0 }
  0x4d   : > { %s429_s23 = sand.u32 1, %s1844_s27   ;;  %p2060_p5 = por %p327_p13, %p45_p9 }
  0x4e   : > { %p2064_p8 = por %p333_p0, %p51_p11  ;;  %s1329_s30 = sshll.u32 %s429_s23, 3 }
  0x4f   : > { %s2334_s16 = scalar_select %p2060_p5, 1, 0 }
  0x50   : > { %s2335_s20 = scalar_select %p2064_p8, 1, 0 }
  0x51   : > { %s1330_s24 = sshll.u32 %s1848_s28, 7  ;;  %s433_s18 = scalar_lea.vmem [#allocation2], %s1329_s30 }
  0x52   : > { %s2072_s5 = scalar_lea.hbm %s2296_s0, %s1330_s24  ;;  %s440_s9 = sshll.u32 %s433_s18, 4  ;;  %s441_s9 = int_to_ptr.vmem [resolvable:$true] %s440_s9 }
  0x53   : > { %p2076_p7 = pnand %p1549_p2, %p2047_p12  ;;  %s430_s29 = scalar_lea.sflag [#allocation3], %s429_s23 }
  0x54   : > { %s1748_s27 = scalar_lea.hbm %s2072_s5, 128  ;;  %s1753_s17 = scalar_lea.hbm %s2296_s0, 256 }
  0x55   : > { %p1749_p9 = scmp.ne.s32.totalorder %s2072_s5, %s1748_s27  ;;  %p1750_p10 = pneg %p2076_p7 }
  0x56   : > { %p1754_p0 = scmp.lt.s32.totalorder %s2072_s5, %s2296_s0  ;;  %p1755_p12 = scmp.lt.s32.totalorder %s1753_s17, %s1748_s27 }
  0x57   : > { %p1751_p11 = pnand %p1750_p10, %p1749_p9 }
  0x58   : > { %p1756_p2 = por %p1755_p12, %p1754_p0 }
  0x59   : > { %p1752_p13 = pneg %p1751_p11 }
  0x5b   : > { %p1757_p4 = pnand %p1756_p2, %p1752_p13 }
  0x5d   : > { %1760 = shalt.err (!%p1757_p4)
}
  0x5e   : > { %s1761_s19 = scalar_lea.vmem %s441_s9, 128  ;;  %s1856_s23 = smov [#allocation2]  }
  0x5f   : > { %p1762_p1 = scmp.ne.s32.totalorder %s441_s9, %s1761_s19  ;;  %s1766_s21 = sshll.u32 %s1856_s23, 4  ;;  %s1767_s21 = int_to_ptr.vmem [resolvable:$false] %s1766_s21 }
  0x60   : > { %s1768_s28 = scalar_lea.vmem %s1767_s21, 256  ;;  %p1769_p9 = scmp.lt.s32.totalorder %s441_s9, %s1767_s21 }
  0x61   : > { %p1764_p8 = pnand %p1762_p1, %p1750_p10  ;;  %p1770_p11 = scmp.lt.s32.totalorder %s1768_s28, %s1761_s19 }
  0x63   : > { %p1765_p5 = pneg %p1764_p8  ;;  %p1771_p6 = por %p1770_p11, %p1769_p9 }
  0x65   : > { %p1772_p3 = pnand %p1771_p6, %p1765_p5 }
  0x67   : > { %1775 = shalt.err (!%p1772_p3)
}
  0x68   : > { %1540 = dma.hbm_to_vmem [thread:$0]  (!%p2076_p7), %s2072_s5, 128, %s441_s9, %s430_s29  }
  0x69   : > { %p2337_p13 = scmp.ne.s32.totalorder %s2324_s15, 0 }
  0x6a   : > { %s2097_s27 = sand.u32 (!%p2337_p13), 1, %s1840_s26   ;;  %p2338_p1 = scmp.ne.s32.totalorder (!%p2337_p13), %s2333_s22, 0 }
  0x6b   : > { %449 = sbr.rel (%p2337_p13) target bundleno = 2401 (0x961), region = 72  ;;  %s1332_s3 = sshll.u32 (!%p2337_p13), %s2097_s27, 3 }
  0x6c   : > { %s452_s21 = scalar_lea.sflag (!%p2337_p13), [#allocation3], %s2097_s27  ;;  %s455_s28 = scalar_lea.vmem (!%p2337_p13), [#allocation2], %s1332_s3 }
  0x70   : > { %1819 = dma.done.wait (%p2338_p1), %s452_s21, 128  }
  0x71   : > { %1821 = vsyncadd (%p2338_p1), %s452_s21, 4294967168  ;;  %p2339_p3 = scmp.eq.s32.totalorder %s1954_s14, 0 }
  0x73   : > { %1823 = dma.done.wait (%p2339_p3), [#allocation6], 1280   ;;  %p2340_p4 = pmov %p2339_p3 }
  0x74   : > { %p2341_p6 = pmov %p2339_p3 }
  0x75   : > { %1825 = vsyncadd (%p2340_p4), [#allocation6], 4294966016 }
  0x76   : > { %1827 = dma.done.wait (%p2341_p6), [#allocation9], 2048   ;;  %p2342_p5 = pmov %p2339_p3 }
  0x77   : > { %v2115_v0 = vld [vmem:[%s455_s28] sm:$0xff]  ;;  %v1857_v1 = vmov 0.0   ;;  %v516_v4 = vlaneseq  ;;  %v1600_v12 = vld [vmem:[#allocation5 + $0x28] sm:$0xff]   ;;  %v1601_v13 = vld [vmem:[#allocation5 + $0x20] sm:$0xff]   ;;  %vm1858_vm1 = vmmov 0   ;;  %s1859_s24 = smov 96  }
  0x78   : > { %1829 = vsyncadd (%p2342_p5), [#allocation9], 4294965248  ;;  %523 = vadd.xlane.f32.xlu0 %v2115_v0  ;;  %1422 = vmatprep.subr.bf16.mxu0 %v1857_v1  ;;  %v1598_v2 = vld [vmem:[#allocation5 + $0x38] sm:$0xff]   ;;  %v1599_v3 = vld [vmem:[#allocation5 + $0x30] sm:$0xff]   ;;  %vm691_vm6 = vcmask 261120   ;;  %vm758_vm13 = vcmask 64512  }
  0x79   : > { %1423 = vmatpush3.bf16.msra.mxu0 %v1598_v2  ;;  %v2122_v5 = vand.u32 127, %v516_v4  ;;  %1438 = vmatprep.mubr.msk.bf16.mxu0 %vm1858_vm1, %v1857_v1  ;;  %v1602_v14 = vld [vmem:[#allocation5 + $0x18] sm:$0xff]   ;;  %v1603_v15 = vld [vmem:[#allocation5 + $0x10] sm:$0xff]   ;;  %v1604_v16 = vld [vmem:[#allocation5 + $0x8] sm:$0xff]   ;;  %v751_v48 = vshrl.u32 %v516_v4, 7  ;;  %s1861_s17 = smov 64  }
  0x7a   : > { %1424 = vmatprep.subr.bf16.mxu0 %v1857_v1  ;;  %v1605_v17 = vld [vmem:[#allocation5] sm:$0xff]   ;;  %v1339_v22 = vld [vmem:[%s2297_s1] ss:$0 sm:$0xff]  ;;  %v1860_v49 = vmov -1e+30   ;;  %vm813_vm14 = vcmask 1043456  }
  0x7b   : > { %vm518_vm0 = vcmp.lt.s32.totalorder %v2122_v5, 32  ;;  %v1340_v24 = vld [vmem:[%s2298_s2] ss:$0 sm:$0xff]  ;;  %vm663_vm2 = vcmp.ge.s32.totalorder %v2122_v5, 8  ;;  %vm667_vm3 = vcmp.lt.s32.totalorder %v2122_v5, 16  ;;  %vm666_vm4 = vcmp.lt.s32.totalorder %v2122_v5, 8 }
  0x7c   : > { %v2128_v8 = vsel %vm518_vm0, 1.0, %v1857_v1  ;;  %v1341_v28 = vld [vmem:[%s2300_s4] ss:$0 sm:$0xff]  ;;  %vm670_vm5 = vmand %vm663_vm2, %vm667_vm3  ;;  %v2155_v32 = vsel %vm666_vm4, 1.0, %v1857_v1  ;;  %vm665_vm7 = vcmp.ge.s32.totalorder %v2122_v5, 24  ;;  %vm664_vm8 = vcmp.ge.s32.totalorder %v2122_v5, 16 }
  0x7d   : > { %1425 = vmatpush3.bf16.msra.mxu0 %v1599_v3  ;;  %v2158_v33 = vsel %vm670_vm5, 1.0, %v1857_v1  ;;  %vm668_vm9 = vcmp.lt.s32.totalorder %v2122_v5, 24  ;;  %vm672_vm10 = vmand %vm665_vm7, %vm518_vm0  ;;  %vm752_vm12 = vcmp.ge.s32.totalorder %v751_v48, %v2122_v5  ;;  %s1383_s29 = sshll.u32 %s1954_s14, 7  ;;  %s513_s22 = scalar_lea.vmem [#allocation11], %s1332_s3 }
  0x7e   : > { %1426 = vmatprep.subr.bf16.mxu0 %v1857_v1  ;;  %vm671_vm11 = vmand %vm664_vm8, %vm668_vm9  ;;  %v2172_v41 = vsel %vm672_vm10, 1.0, %v1857_v1  ;;  %v753_v50 = vsel %vm752_vm12, 0.0, %v1860_v49  ;;  %s2253_s18 = scalar_lea.hbm %s2309_s13, %s1383_s29  ;;  %s1201_s14 = scalar_lea.sflag [#allocation4], %s2097_s27 }
  0x7f   : > { %v2175_v43 = vsel %vm671_vm11, 1.0, %v1857_v1  ;;  %p2343_p7 = scmp.ne.s32.totalorder %s2334_s16, 0  ;;  %s1862_s19 = smov [#allocation11]  }
  0x80   : > { %s1780_s23 = sshll.u32 %s1862_s19, 4  ;;  %s1781_s23 = int_to_ptr.vmem [resolvable:$false] %s1780_s23 }
  0x81   : > { %1427 = vmatpush3.bf16.msra.mxu0 %v1600_v12  ;;  %s1782_s21 = scalar_lea.vmem %s1781_s23, 256 }
  0x82   : > { %1428 = vmatprep.subr.bf16.mxu0 %v1857_v1 }
  0x85   : > { %1429 = vmatpush3.bf16.msra.mxu0 %v1601_v13 }
  0x86   : > { %1430 = vmatprep.subr.bf16.mxu0 %v1857_v1 }
  0x89   : > { %1431 = vmatpush3.bf16.msra.mxu0 %v1602_v14 }
  0x8a   : > { %1432 = vmatprep.subr.bf16.mxu0 %v1857_v1 }
  0x8d   : > { %1433 = vmatpush3.bf16.msra.mxu0 %v1603_v15 }
  0x8e   : > { %1434 = vmatprep.subr.bf16.mxu0 %v1857_v1 }
  0x91   : > { %1435 = vmatpush3.bf16.msra.mxu0 %v1604_v16 }
  0x92   : > { %1436 = vmatprep.subr.bf16.mxu0 %v1857_v1 }
  0x95   : > { %1437 = vmatpush3.bf16.msra.mxu0 %v1605_v17 }
  0x96   : > { %1482 = vmatprep.subr.bf16.mxu0 %v1857_v1 }
 0x101   : > { %v524_v6 = vpop.xlane.xlu0 %523 }
 0x102   : > { %v525_v7 = vmul.f32 0.03125, %v524_v6 }
 0x104   : > { %v526_v9 = vsub.f32 %v2115_v0, %v525_v7 }
 0x106   : > { %v527_v10 = vmul.f32 %v2128_v8, %v526_v9 }
 0x108   : > { %v528_v11 = vmul.f32 %v527_v10, %v527_v10 }
 0x10a   : > { %529 = vadd.xlane.f32.xlu0 %v528_v11 }
 0x193   : > { %v530_v18 = vpop.xlane.xlu0 %529 }
 0x194   : > { %v531_v19 = vmul.f32 0.03125, %v530_v18 }
 0x196   : > { %v532_v20 = vadd.f32 1e-05, %v531_v19 }
 0x198   : > { %1624 = vrsqrt.f32 %v532_v20 }
 0x1a5   : > { %v1625_v21 = vpop.eup %1624 }
 0x1a6   : > { %v534_v23 = vmul.f32 %v1625_v21, %v527_v10 }
 0x1a8   : > { %v541_v25 = vmul.f32 %v1339_v22, %v534_v23 }
 0x1aa   : > { %v548_v26 = vadd.f32 %v1340_v24, %v541_v25 }
 0x1ac   : > { %v549_v27 = vpack.c.bf16 %v548_v26, %v548_v26 }
 0x1ae   : > { %1439 = vmatmul.mubr.bf16.vlgmr.msra.gmra.mxu0 %v549_v27 }
 0x1af   : > { %1498 = vmatprep.mubr.msk.bf16.mxu0 %vm1858_vm1, %v1857_v1 }
 0x26e   : > { %v655_v29 = vpop.f32.mrf.mxu0 }
 0x26f   : > { %v656_v30 = vadd.f32 %v1341_v28, %v655_v29 }
 0x270   : > { %v1440_v31 = vpop.f32.mrf.mxu0 }
 0x271   : > { %v661_v34 = vmul.f32 0.35355338, %v656_v30  ;;  %v2160_v35 = vpack.c.bf16 %v656_v30, %v656_v30 }
 0x272   : > { %v658_v36 = vpop.f32.mrf.mxu0 }
 0x273   : > { %689 = vrot.lane.b32.xlu1 %v2160_v35, %s1859_s24  ;;  %v681_v37 = vmul.f32 %v2155_v32, %v661_v34  ;;  %v682_v38 = vmul.f32 %v2158_v33, %v661_v34  ;;  %v683_v45 = vmul.f32 %v2175_v43, %v661_v34  ;;  %v684_v46 = vmul.f32 %v2172_v41, %v661_v34  ;;  %s1214_s24 = sshll.u32 %s513_s22, 4  ;;  %s2255_s24 = int_to_ptr.vmem [resolvable:$true] %s1214_s24 }
 0x274   : > { %v1441_v39 = vpop.f32.mrf.mxu0  ;;  %s1776_s3 = scalar_lea.vmem %s2255_s24, 128  ;;  %p1783_p12 = scmp.lt.s32.totalorder %s2255_s24, %s1781_s23 }
 0x275   : > { %v685_v40 = vpack.c.bf16 %v682_v38, %v681_v37  ;;  %v686_v47 = vpack.c.bf16 %v684_v46, %v683_v45  ;;  %p1777_p8 = scmp.ne.s32.totalorder %s2255_s24, %s1776_s3  ;;  %p1784_p2 = scmp.lt.s32.totalorder %s1782_s21, %s1776_s3 }
 0x277   : > { %1444 = vmatprep.mubr.msk.bf16.mxu1 %vm691_vm6, %v685_v40  ;;  %v1606_v40 = vld [vmem:[#allocation7 + $0x8] sm:$0xff]   ;;  %p1778_p10 = pnand %p1777_p8, %p2343_p7  ;;  %p1785_p9 = por %p1784_p2, %p1783_p12 }
 0x279   : > { %p1779_p0 = pneg %p1778_p10 }
 0x27b   : > { %p1786_p11 = pnand %p1785_p9, %p1779_p0 }
 0x2e5   : > { %v690_v42 = vpop.permute.xlu1 %689 }
 0x2e6   : > { %1502 = vmatprep.subr.msk.bf16.mxu1 %vm691_vm6, %v690_v42  ;;  %v699_v44 = vsel %vm691_vm6, %v690_v42, 0  ;;  %v1607_v42 = vld [vmem:[#allocation7] sm:$0xff]  }
 0x2e7   : > { %1443 = vmatpush3.bf16.xpose.msra.mxu1 %v699_v44 }
 0x2ee   : > { %1445 = vmatmul.mubr.msk.bf16.vlgmr.msra.gmra.mxu1 %vm691_vm6, %v686_v47 }
 0x3ae   : > { %v1446_v51 = vpop.f32.mrf.mxu1 }
 0x3af   : > { %v756_v52 = vadd.f32 %v1446_v51, %v753_v50 }
 0x3b0   : > { %v735_v53 = vpop.f32.mrf.mxu1 }
 0x3b1   : > { %v754_v54 = vadd.f32 %v753_v50, %v735_v53  ;;  %v765_v55 = vsel %vm758_vm13, %v756_v52, -inf }
 0x3b2   : > { %766 = vmax.xlane.f32.xlu0 %v765_v55  ;;  %v1447_v56 = vpop.f32.mrf.mxu1 }
 0x3b3   : > { %v759_v57 = vsel %vm758_vm13, %v754_v54, -inf  ;;  %v757_v60 = vadd.f32 %v1447_v56, %v753_v50 }
 0x3b4   : > { %760 = vmax.xlane.f32.xlu1 %v759_v57  ;;  %v738_v58 = vpop.f32.mrf.mxu1 }
 0x3b5   : > { %v755_v59 = vadd.f32 %v753_v50, %v738_v58  ;;  %v768_v62 = vsel %vm758_vm13, %v757_v60, -inf }
 0x3b7   : > { %v762_v61 = vsel %vm758_vm13, %v755_v59, -inf }
 0x3b8   : > { %763 = vmax.xlane.f32.xlu0 %v762_v61 }
 0x3bc   : > { %769 = vmax.xlane.f32.xlu0 %v768_v62 }
 0x43b   : > { %v767_v63 = vpop.xlane.xlu0 %766 }
 0x43c   : > { %v773_v2 = vsub.f32 %v756_v52, %v767_v63  ;;  %v1608_v63 = vld [vmem:[#allocation8 + $0x38] sm:$0xff]  }
 0x43d   : > { %v761_v3 = vpop.xlane.xlu1 %760 }
 0x43e   : > { %v779_v4 = vmul.f32 1.442695, %v773_v2  ;;  %v771_v5 = vsub.f32 %v754_v54, %v761_v3  ;;  %v1609_v2 = vld [vmem:[#allocation8 + $0x30] sm:$0xff]  }
 0x440   : > { %1626 = vpow2.f32 %v779_v4  ;;  %v775_v6 = vmul.f32 1.442695, %v771_v5 }
 0x441   : > { %v764_v7 = vpop.xlane.xlu0 %763 }
 0x442   : > { %1628 = vpow2.f32 %v775_v6  ;;  %v772_v9 = vsub.f32 %v755_v59, %v764_v7  ;;  %v1610_v7 = vld [vmem:[#allocation8 + $0x28] sm:$0xff]  }
 0x444   : > { %v777_v12 = vmul.f32 1.442695, %v772_v9  ;;  %v1611_v9 = vld [vmem:[#allocation8 + $0x20] sm:$0xff]  }
 0x445   : > { %v770_v10 = vpop.xlane.xlu0 %769 }
 0x446   : > { %v774_v11 = vsub.f32 %v757_v60, %v770_v10  ;;  %v1612_v10 = vld [vmem:[#allocation8 + $0x18] sm:$0xff]  }
 0x448   : > { %v781_v13 = vmul.f32 1.442695, %v774_v11  ;;  %v1613_v11 = vld [vmem:[#allocation8 + $0x10] sm:$0xff]  }
 0x44a   : > { %1630 = vpow2.f32 %v781_v13  ;;  %v1616_v13 = vld [vmem:[#allocation10 + $0x38] sm:$0xff]  }
 0x44b   : > { %1632 = vpow2.f32 %v777_v12  ;;  %v1614_v12 = vld [vmem:[#allocation8 + $0x8] sm:$0xff]   ;;  %1483 = vmatpush3.bf16.msra.mxu0 %v1616_v13 }
 0x44c   : > { %1484 = vmatprep.subr.bf16.mxu0 %v1857_v1 }
 0x44d   : > { %v1627_v14 = vpop.eup %1626 }
 0x44e   : > { %v789_v15 = vsel %vm758_vm13, %v1627_v14, 0.0 }
 0x44f   : > { %v1629_v16 = vpop.eup %1628  ;;  %790 = vadd.xlane.f32.xlu0 %v789_v15  ;;  %v1618_v15 = vld [vmem:[#allocation10 + $0x28] sm:$0xff]  }
 0x450   : > { %v783_v17 = vsel %vm758_vm13, %v1629_v16, 0.0 }
 0x453   : > { %784 = vadd.xlane.f32.xlu0 %v783_v17  ;;  %v1620_v17 = vld [vmem:[#allocation10 + $0x18] sm:$0xff]  }
 0x457   : > { %v1631_v18 = vpop.eup %1630 }
 0x458   : > { %v792_v19 = vsel %vm758_vm13, %v1631_v18, 0.0  ;;  %v1633_v20 = vpop.eup %1632 }
 0x459   : > { %793 = vadd.xlane.f32.xlu0 %v792_v19  ;;  %v786_v21 = vsel %vm758_vm13, %v1633_v20, 0.0 }
 0x45d   : > { %787 = vadd.xlane.f32.xlu0 %v786_v21 }
 0x473   : > { %805 = vrot.lane.b32.xlu0 %v2160_v35, %s1861_s17 }
 0x4d8   : > { %v791_v22 = vpop.xlane.xlu0 %790 }
 0x4dc   : > { %v785_v23 = vpop.xlane.xlu0 %784 }
 0x4e2   : > { %v794_v24 = vpop.xlane.xlu0 %793 }
 0x4e3   : > { %1634 = vrcp.f32 %v794_v24 }
 0x4e4   : > { %1636 = vrcp.f32 %v785_v23  ;;  %v1362_v23 = vld [vmem:[%s2303_s7] ss:$0 sm:$0xff] }
 0x4e5   : > { %1638 = vrcp.f32 %v791_v22 }
 0x4e6   : > { %v788_v25 = vpop.xlane.xlu0 %787 }
 0x4e7   : > { %1640 = vrcp.f32 %v788_v25  ;;  %v1363_v25 = vld [vmem:[%s2304_s8] ss:$0 sm:$0xff] }
 0x4ea   : > { %v806_v26 = vpop.permute.xlu0 %805 }
 0x4eb   : > { %v815_v27 = vsel %vm813_vm14, %v806_v26, 0  ;;  %1503 = vmatprep.subr.msk.bf16.mxu1 %vm813_vm14, %v806_v26 }
 0x4ec   : > { %1449 = vmatpush3.bf16.msra.mxu1 %v815_v27 }
 0x4ed   : > { %1454 = vmatprep.subr.bf16.mxu1 %v1857_v1 }
 0x4f0   : > { %v1635_v28 = vpop.eup %1634 }
 0x4f1   : > { %v1637_v29 = vpop.eup %1636  ;;  %v802_v34 = vmul.f32 %v1635_v28, %v1631_v18  ;;  %v1621_v18 = vld [vmem:[#allocation10 + $0x10] sm:$0xff]  }
 0x4f2   : > { %v1639_v30 = vpop.eup %1638  ;;  %v799_v35 = vmul.f32 %v1637_v29, %v1629_v16  ;;  %v1619_v16 = vld [vmem:[#allocation10 + $0x20] sm:$0xff]   ;;  %v1622_v29 = vld [vmem:[#allocation10 + $0x8] sm:$0xff]  }
 0x4f3   : > { %v801_v37 = vmul.f32 %v1639_v30, %v1627_v14  ;;  %v1617_v14 = vld [vmem:[#allocation10 + $0x30] sm:$0xff]   ;;  %v1623_v30 = vld [vmem:[#allocation10] sm:$0xff]  }
 0x4f4   : > { %v1641_v31 = vpop.eup %1640  ;;  %1485 = vmatpush3.bf16.msra.mxu0 %v1617_v14 }
 0x4f5   : > { %v800_v36 = vmul.f32 %v1641_v31, %v1633_v20  ;;  %v804_v39 = vpack.c.bf16 %v802_v34, %v801_v37  ;;  %1486 = vmatprep.subr.bf16.mxu0 %v1857_v1  ;;  %v1364_v31 = vld [vmem:[%s2306_s10] ss:$0 sm:$0xff] }
 0x4f7   : > { %v803_v38 = vpack.c.bf16 %v800_v36, %v799_v35 }
 0x4f8   : > { %1487 = vmatpush3.bf16.msra.mxu0 %v1618_v15 }
 0x4f9   : > { %1450 = vmatprep.mubr.msk.bf16.mxu1 %vm758_vm13, %v803_v38  ;;  %1488 = vmatprep.subr.bf16.mxu0 %v1857_v1 }
 0x4fa   : > { %1451 = vmatmul.mubr.msk.bf16.vlgmr.msra.gmra.mxu1 %vm758_vm13, %v804_v39 }
 0x4fb   : > { %1458 = vmatprep.mubr.msk.bf16.mxu1 %vm1858_vm1, %v1857_v1  ;;  %1455 = vmatpush3.bf16.msra.mxu1 %v1606_v40 }
 0x4fc   : > { %1456 = vmatprep.subr.bf16.mxu1 %v1857_v1  ;;  %1489 = vmatpush3.bf16.msra.mxu0 %v1619_v16 }
 0x4fd   : > { %1490 = vmatprep.subr.bf16.mxu0 %v1857_v1 }
 0x4ff   : > { %1457 = vmatpush3.bf16.msra.mxu1 %v1607_v42  ;;  %v1373_v42 = vld [vmem:[%s2308_s12] ss:$0 sm:$0xff] }
 0x500   : > { %1462 = vmatprep.subr.bf16.mxu1 %v1857_v1  ;;  %1491 = vmatpush3.bf16.msra.mxu0 %v1620_v17 }
 0x501   : > { %1492 = vmatprep.subr.bf16.mxu0 %v1857_v1 }
 0x504   : > { %1493 = vmatpush3.bf16.msra.mxu0 %v1621_v18 }
 0x505   : > { %1494 = vmatprep.subr.bf16.mxu0 %v1857_v1 }
 0x508   : > { %1495 = vmatpush3.bf16.msra.mxu0 %v1622_v29 }
 0x509   : > { %1496 = vmatprep.subr.bf16.mxu0 %v1857_v1 }
 0x50c   : > { %1497 = vmatpush3.bf16.msra.mxu0 %v1623_v30 }
 0x5ba   : > { %v1452_v44 = vpop.f32.mrf.mxu1 }
 0x5bb   : > { %v868_v49 = vmul.f32 %v1452_v44, %v2175_v43 }
 0x5bc   : > { %v851_v45 = vpop.f32.mrf.mxu1 }
 0x5bd   : > { %v866_v47 = vmul.f32 %v2155_v32, %v851_v45  ;;  %v873_v55 = vsel %vm691_vm6, %v868_v49, 0.0  ;;  %v1358_v32 = vld [vmem:[%s2302_s6] ss:$0 sm:$0xff] }
 0x5be   : > { %v1453_v46 = vpop.f32.mrf.mxu1 }
 0x5bf   : > { %v870_v51 = vsel %vm691_vm6, %v866_v47, 0.0  ;;  %v869_v52 = vmul.f32 %v1453_v46, %v2172_v41 }
 0x5c0   : > { %v854_v48 = vpop.f32.mrf.mxu1 }
 0x5c1   : > { %v867_v50 = vmul.f32 %v2158_v33, %v854_v48  ;;  %v875_v57 = vsel %vm691_vm6, %v869_v52, 0.0 }
 0x5c3   : > { %v871_v53 = vsel %vm691_vm6, %v867_v50, 0.0 }
 0x5c4   : > { %v872_v54 = vadd.f32 %v871_v53, %v870_v51 }
 0x5c6   : > { %v874_v56 = vadd.f32 %v873_v55, %v872_v54 }
 0x5c8   : > { %v876_v58 = vadd.f32 %v875_v57, %v874_v56 }
 0x5ca   : > { %v877_v59 = vpack.c.bf16 %v876_v58, %v876_v58 }
 0x5cc   : > { %1459 = vmatmul.mubr.msk.bf16.vlgmr.msra.gmra.mxu1 %vm691_vm6, %v877_v59 }
 0x5cd   : > { %1478 = vmatprep.mubr.msk.bf16.mxu1 %vm1858_vm1, %v1857_v1  ;;  %1463 = vmatpush3.bf16.msra.mxu1 %v1608_v63 }
 0x5ce   : > { %1464 = vmatprep.subr.bf16.mxu1 %v1857_v1 }
 0x5d1   : > { %1465 = vmatpush3.bf16.msra.mxu1 %v1609_v2 }
 0x5d2   : > { %1466 = vmatprep.subr.bf16.mxu1 %v1857_v1 }
 0x5d5   : > { %1467 = vmatpush3.bf16.msra.mxu1 %v1610_v7 }
 0x5d6   : > { %1468 = vmatprep.subr.bf16.mxu1 %v1857_v1 }
 0x5d9   : > { %1469 = vmatpush3.bf16.msra.mxu1 %v1611_v9 }
 0x5da   : > { %1470 = vmatprep.subr.bf16.mxu1 %v1857_v1 }
 0x5dd   : > { %1471 = vmatpush3.bf16.msra.mxu1 %v1612_v10 }
 0x5de   : > { %1472 = vmatprep.subr.bf16.mxu1 %v1857_v1 }
 0x5e1   : > { %1473 = vmatpush3.bf16.msra.mxu1 %v1613_v11 }
 0x5e2   : > { %1474 = vmatprep.subr.bf16.mxu1 %v1857_v1 }
 0x5e5   : > { %1475 = vmatpush3.bf16.msra.mxu1 %v1614_v12 }
 0x5e6   : > { %1476 = vmatprep.subr.bf16.mxu1 %v1857_v1 }
 0x68c   : > { %v938_v33 = vpop.f32.mrf.mxu1 }
 0x68d   : > { %v939_v41 = vadd.f32 %v1358_v32, %v938_v33 }
 0x68e   : > { %v1460_v43 = vpop.f32.mrf.mxu1 }
 0x68f   : > { %v2215_v60 = vadd.f32 %v939_v41, %v2115_v0 }
 0x690   : > { %v941_v61 = vpop.f32.mrf.mxu1 }
 0x691   : > { %947 = vadd.xlane.f32.xlu1 %v2215_v60 }
 0x692   : > { %v1461_v62 = vpop.f32.mrf.mxu1 }
 0x71a   : > { %v948_v3 = vpop.xlane.xlu1 %947 }
 0x71b   : > { %v949_v4 = vmul.f32 0.03125, %v948_v3 }
 0x71d   : > { %v950_v5 = vsub.f32 %v2215_v60, %v949_v4 }
 0x71f   : > { %v951_v6 = vmul.f32 %v2128_v8, %v950_v5  ;;  %v1615_v8 = vld [vmem:[#allocation8] sm:$0xff]  }
 0x720   : > { %1477 = vmatpush3.bf16.msra.mxu1 %v1615_v8 }
 0x721   : > { %v952_v0 = vmul.f32 %v951_v6, %v951_v6 }
 0x723   : > { %953 = vadd.xlane.f32.xlu1 %v952_v0 }
 0x7ac   : > { %v954_v19 = vpop.xlane.xlu1 %953 }
 0x7ad   : > { %v955_v20 = vmul.f32 0.03125, %v954_v19 }
 0x7af   : > { %v956_v21 = vadd.f32 1e-05, %v955_v20 }
 0x7b1   : > { %1642 = vrsqrt.f32 %v956_v21 }
 0x7be   : > { %v1643_v22 = vpop.eup %1642 }
 0x7bf   : > { %v958_v24 = vmul.f32 %v1643_v22, %v951_v6 }
 0x7c1   : > { %v965_v26 = vmul.f32 %v1362_v23, %v958_v24 }
 0x7c3   : > { %v972_v27 = vadd.f32 %v1363_v25, %v965_v26 }
 0x7c5   : > { %v973_v28 = vpack.c.bf16 %v972_v27, %v972_v27 }
 0x7c7   : > { %1479 = vmatmul.mubr.bf16.vlgmr.msra.gmra.mxu1 %v973_v28 }
 0x887   : > { %v1079_v34 = vpop.f32.mrf.mxu1 }
 0x888   : > { %v1080_v35 = vadd.f32 %v1364_v31, %v1079_v34 }
 0x889   : > { %v1480_v36 = vpop.f32.mrf.mxu1 }
 0x88a   : > { %v1085_v37 = vmax.f32 %v1080_v35, 0.0 }
 0x88b   : > { %v1082_v38 = vpop.f32.mrf.mxu1 }
 0x88c   : > { %v1086_v39 = vpack.c.bf16 %v1085_v37, %v1085_v37 }
 0x88d   : > { %v1481_v40 = vpop.f32.mrf.mxu1 }
 0x88e   : > { %1499 = vmatmul.mubr.bf16.vlgmr.msra.gmra.mxu0 %v1086_v39 }
 0x94e   : > { %v1192_v1 = vpop.f32.mrf.mxu0 }
 0x94f   : > { %v1193_v44 = vadd.f32 %v1373_v42, %v1192_v1 }
 0x950   : > { %v1500_v45 = vpop.f32.mrf.mxu0 }
 0x951   : > { %v1198_v46 = vadd.f32 %v1193_v44, %v2215_v60 }
 0x952   : > { %v1195_v47 = vpop.f32.mrf.mxu0 }
 0x953   : > { %1199 = vst [vmem:[%s513_s22] sm:$0xff] %v1198_v46 }
 0x954   : > { %v1501_v48 = vpop.f32.mrf.mxu0 }
 0x955   : > { %1789 = shalt.err (!%p1786_p11)
}
 0x956   : > { %s1790_s28 = scalar_lea.hbm %s2253_s18, 128  ;;  %s1794_s9 = scalar_lea.hbm %s2309_s13, 256 }
 0x957   : > { %p1791_p13 = scmp.ne.s32.totalorder %s2253_s18, %s1790_s28  ;;  %p1795_p4 = scmp.lt.s32.totalorder %s2253_s18, %s2309_s13 }
 0x958   : > { %p1796_p6 = scmp.lt.s32.totalorder %s1794_s9, %s1790_s28 }
 0x959   : > { %p1792_p1 = pnand %p1791_p13, %p2343_p7 }
 0x95a   : > { %p1797_p5 = por %p1796_p6, %p1795_p4 }
 0x95b   : > { %p1793_p3 = pneg %p1792_p1 }
 0x95d   : > { %p1798_p8 = pnand %p1797_p5, %p1793_p3 }
 0x95f   : > { %1801 = shalt.err (!%p1798_p8)
}
 0x960   : > { %1522 = dma.vmem_to_hbm [thread:$0]  (%p2343_p7), %s2255_s24, 128, %s2253_s18, %s1201_s14  }
 0x961 PF: > { %s2344_s29 = sld [smem:[#allocation17_spill]]  ;;  %s1226_s22 = sand.u32 1, %s1836_s25  }
 0x962   : > { %p2345_p10 = scmp.ne.s32.totalorder %s2335_s20, 0  ;;  %s1227_s17 = scalar_lea.sflag [#allocation4], %s1226_s22 }
 0x967   : > { %p2346_p0 = scmp.ge.s32.totalorder %s2344_s29, 2 }
 0x969   : > { %p1542_p12 = pnand %p2346_p0, %p2345_p10 }
 0x96b   : > { %p1543_p2 = pneg %p1542_p12 }
 0x96d   : > { %1831 = dma.done.wait (%p1543_p2), %s1227_s17, 128  }
 0x96e   : > { %1833 = vsyncadd (%p1543_p2), %s1227_s17, 4294967168  ;;  %s2347_s28 = sld [smem:[#allocation18_spill]]  ;;  %s2350_s25 = smov %s1840_s26 }
 0x96f   : > { %s2348_s30 = sld [smem:[#allocation16_spill]] }
 0x970   : > { %s2349_s27 = sld [smem:[#allocation19_spill]] }
 0x974   : > { %p28_p9 = scmp.ge.s32.totalorder %s2347_s28, 4  }
 0x975   : > { %s2351_s26 = smov %s2348_s30 }
 0x976   :  { %30 = sbr.rel (!%p28_p9) target bundleno = 12 (0xc), region = 133 }
 0x97b   :  { %1232 = vsyncpa [#allocation3], 1 }
 0x97c   :  { %1234 = vsyncpa [#allocation3 + $0x1], 1 }
 0x97d   :  { %1235 = vsyncpa [#allocation6], 1 }
 0x97e   :  { %1236 = vsyncpa [#allocation9], 1 }
 0x97f   :  { %1237 = vsyncpa [#allocation4], 1 }
 0x980   :  { %1239 = vsyncpa [#allocation4 + $0x1], 1 }

</bundles_post_ra>
